<compile_context>
chip_gen: v7x
topology: tpu7x:2x2x1
jax: 0.10.0
libtpu: 0.0.40
codegen_flags: <defaults>
</compile_context>

<pallas_src>
import functools

import jax
import jax.numpy as jnp
from jax.experimental import pallas as pl
from jax.experimental.pallas import tpu as pltpu

HIDDEN = 128     # hidden width of the affine layer (fixed by the module)
ACT_PAD = 128    # lane-dense padded action axis (unmasked full-width stores)

_TB_BUCKETS = (8, 16, 32, 64, 128, 256, 512, 1024)   # static-jit tile sizes


def _pick_tile_b(b):
    """Largest bucket tile that still leaves >= 2 grid steps (so v7x's two
    TensorCores can split the batch axis), capped at 1024 rows.  Batches of
    <= 8 rows fall back to a single 8-row (sublane-aligned) tile."""
    half = (b + 1) // 2
    tb = _TB_BUCKETS[0]
    for cand in _TB_BUCKETS:
        if cand <= half:
            tb = cand
    return tb


def _policy_kernel(x_ref, w1_ref, b1_ref, w2_ref, b2_ref, o_ref, *, num_actions):
    # x_ref : (TB, obs) f32       w1_ref: (obs, 128) cdt      b1_ref: (1, 128) f32
    # w2_ref: (128, ACT_PAD) cdt  b2_ref: (1, ACT_PAD) f32    o_ref : (TB, ACT_PAD) f32
    cdt = w1_ref.dtype                     # compute dtype: f32 (default) or bf16
    x = x_ref[...].astype(cdt)

    # affine: Linear(obs, 128); Dropout(p=0.6) == identity in eval mode; ReLU
    # TODO(synk): training-mode stochastic dropout mask not implemented.
    h = jnp.dot(x, w1_ref[...], preferred_element_type=jnp.float32) + b1_ref[...]
    h = jnp.maximum(h, 0.0)

    # action_head: Linear(128, act); padded action lanes masked after the matmul
    logits = jnp.dot(h.astype(cdt), w2_ref[...],
                     preferred_element_type=jnp.float32) + b2_ref[...]
    if num_actions < logits.shape[-1]:
        lane = jax.lax.broadcasted_iota(jnp.int32, logits.shape, 1)
        logits = jnp.where(lane < num_actions, logits, -jnp.inf)

    # per-row softmax over the action axis (== PyTorch dim=0 for a 1-D state)
    m = jnp.max(logits, axis=-1, keepdims=True)
    e = jnp.exp(logits - m)                       # masked lanes: exp(-inf) == 0
    denom = jnp.sum(e, axis=-1, keepdims=True)
    o_ref[...] = e * pl.reciprocal(denom, approx=True)   # EUP vrcp (idle slot)


def prepare_params(w1, b1, w2, b2, *, act_pad=ACT_PAD, compute_dtype=jnp.float32):
    """One-time packing of weights into final dtype/shape/padding.

    Expects x @ W layout (PyTorch's (out, in) Linear weights pre-transposed):
      w1: (obs, 128)   b1: (128,)   w2: (128, act)   b2: (act,)
    Padded w2 columns / b2 entries are zero; the kernel masks the padded action
    lanes itself, so they always carry exactly 0 probability.
    compute_dtype=jnp.bfloat16 enables the matmul-input bf16 path (v6e/v7x).
    """
    act = w2.shape[1]
    assert w1.shape[1] == HIDDEN and w2.shape[0] == HIDDEN and act <= act_pad
    w1p = jnp.asarray(w1, compute_dtype)
    b1p = jnp.asarray(b1, jnp.float32).reshape(1, HIDDEN)
    w2p = jnp.zeros((HIDDEN, act_pad), compute_dtype).at[:, :act].set(
        jnp.asarray(w2, compute_dtype))
    b2p = jnp.zeros((1, act_pad), jnp.float32).at[0, :act].set(
        jnp.asarray(b2, jnp.float32))
    return w1p, b1p, w2p, b2p, act


@functools.partial(jax.jit, static_argnames=("tile_b", "num_actions"))
def _policy_call(states, w1, b1, w2p, b2p, *, tile_b, num_actions):
    b, obs = states.shape
    act_pad = w2p.shape[1]
    grid = (pl.cdiv(b, tile_b),)          # ragged final block is masked by Pallas
    kernel = functools.partial(_policy_kernel, num_actions=num_actions)
    return pl.pallas_call(
        kernel,
        out_shape=jax.ShapeDtypeStruct((b, act_pad), jnp.float32),
        grid=grid,
        in_specs=[
            pl.BlockSpec((tile_b, obs), lambda i: (i, 0)),      # states tile
            pl.BlockSpec((obs, HIDDEN), lambda i: (0, 0)),      # w1 (resident)
            pl.BlockSpec((1, HIDDEN), lambda i: (0, 0)),        # b1 (resident)
            pl.BlockSpec((HIDDEN, act_pad), lambda i: (0, 0)),  # w2 (resident)
            pl.BlockSpec((1, act_pad), lambda i: (0, 0)),       # b2 (resident)
        ],
        out_specs=pl.BlockSpec((tile_b, act_pad), lambda i: (i, 0)),
        compiler_params=pltpu.CompilerParams(
            dimension_semantics=("parallel",)),                 # v7x megacore
    )(states, w1, b1, w2p, b2p)


def policy_forward_padded(states, params, *, tile_b=None):
    """states: (B, obs) -> (B, ACT_PAD) f32 probabilities, padded action lanes
    are exactly 0.  Preferred output for downstream kernels/consumers: avoids
    the extra HBM pass of slicing off the padded lanes."""
    w1, b1, w2p, b2p, act = params
    states = jnp.asarray(states, jnp.float32)
    b, _ = states.shape
    tb = _pick_tile_b(b) if tile_b is None else tile_b
    return _policy_call(states, w1, b1, w2p, b2p, tile_b=tb, num_actions=act)


def policy_forward(states, params, *, tile_b=None):
    """states: (B, obs) -> (B, act) per-state action probabilities (module
    parity shape; incurs one extra slice pass vs policy_forward_padded)."""
    act = params[4]
    return policy_forward_padded(states, params, tile_b=tile_b)[:, :act]


def policy_forward_single(state, params):
    """Original 1-D module semantics: state (obs,) -> action probs (act,)."""
    return policy_forward(state.reshape(1, -1), params)[0]


def init_params(key, obs_size, act_size, hidden=HIDDEN):
    """Deterministic PyTorch-style Linear init: U(-1/sqrt(fan_in), +1/sqrt(fan_in))."""
    k1, k2, k3, k4 = jax.random.split(key, 4)
    bound1 = 1.0 / jnp.sqrt(obs_size)
    bound2 = 1.0 / jnp.sqrt(hidden)
    w1 = jax.random.uniform(k1, (obs_size, hidden), jnp.float32, -bound1, bound1)
    b1 = jax.random.uniform(k2, (hidden,), jnp.float32, -bound1, bound1)
    w2 = jax.random.uniform(k3, (hidden, act_size), jnp.float32, -bound2, bound2)
    b2 = jax.random.uniform(k4, (act_size,), jnp.float32, -bound2, bound2)
    return w1, b1, w2, b2


if __name__ == "__main__":
    # Small synthetic obs/action space; 300 rows -> tile_b=128, grid of 3 steps
    # (>= 2 parallel steps for v7x) with a ragged 44-row final block.
    OBS, ACT, BATCH = 16, 8, 300

    key = jax.random.PRNGKey(0)
    kp, kx = jax.random.split(key)
    w1, b1, w2, b2 = init_params(kp, OBS, ACT)
    states = jax.random.normal(kx, (BATCH, OBS), jnp.float32)

    # plain-JAX reference (per-state: identical to the PyTorch 1-D forward)
    h_ref = jnp.maximum(states @ w1 + b1, 0.0)
    probs_ref = jax.nn.softmax(h_ref @ w2 + b2, axis=-1)

    # ---- f32 path (default; strict parity modulo the approx reciprocal) ----
    params = prepare_params(w1, b1, w2, b2)
    probs_pad = jax.block_until_ready(policy_forward_padded(states, params))
    probs = probs_pad[:, :ACT]

    assert probs_pad.shape == (BATCH, ACT_PAD)
    assert jnp.allclose(probs_pad[:, ACT:], 0.0)                 # padded lanes == 0
    assert jnp.allclose(probs, probs_ref, atol=5e-3, rtol=5e-3)
    assert jnp.allclose(jnp.sum(probs, axis=-1), 1.0, atol=5e-3)

    # single 1-D state path (original module call shape; sub-tile batch bucket)
    p0 = jax.block_until_ready(policy_forward_single(states[0], params))
    assert p0.shape == (ACT,)
    assert jnp.allclose(p0, probs_ref[0], atol=5e-3, rtol=5e-3)

    # ---- optional bf16 matmul-input path (v6e/v7x), relaxed tolerance ----
    params_bf16 = prepare_params(w1, b1, w2, b2, compute_dtype=jnp.bfloat16)
    probs_bf16 = jax.block_until_ready(policy_forward(states, params_bf16))
    assert probs_bf16.shape == (BATCH, ACT)
    assert jnp.allclose(probs_bf16, probs_ref, atol=5e-2)
    assert jnp.allclose(jnp.sum(probs_bf16, axis=-1), 1.0, atol=2e-2)

    print("KERNEL_OK")
</pallas_src>

<mosaic_0001>
module attributes {stable_mosaic.version = 11 : i64} {
  func.func @_policy_kernel(%arg0: i32, %arg1: memref<128x16xf32, #tpu.memory_space<vmem>>, %arg2: memref<16x128xf32, #tpu.memory_space<vmem>>, %arg3: memref<1x128xf32, #tpu.memory_space<vmem>>, %arg4: memref<128x128xf32, #tpu.memory_space<vmem>>, %arg5: memref<1x128xf32, #tpu.memory_space<vmem>>, %arg6: memref<128x128xf32, #tpu.memory_space<vmem>>) attributes {dimension_semantics = [#tpu.dimension_semantics<parallel>], iteration_bounds = array<i64: 3>, scalar_prefetch = 0 : i64, scratch_operands = 0 : i64, tpu.core_type = #tpu.core_type<tc>, window_params = [{transform_indices = @transform_0, window_bounds = array<i64: 128, 16>}, {pipeline_mode = #tpu.pipeline_mode<synchronous>, transform_indices = @transform_1, window_bounds = array<i64: 16, 128>}, {pipeline_mode = #tpu.pipeline_mode<synchronous>, transform_indices = @transform_2, window_bounds = array<i64: 1, 128>}, {pipeline_mode = #tpu.pipeline_mode<synchronous>, transform_indices = @transform_3, window_bounds = array<i64: 128, 128>}, {pipeline_mode = #tpu.pipeline_mode<synchronous>, transform_indices = @transform_4, window_bounds = array<i64: 1, 128>}, {transform_indices = @transform_5, window_bounds = array<i64: 128, 128>}]} {
    %c0 = arith.constant 0 : index
    %c0_0 = arith.constant 0 : index
    %0 = vector.load %arg1[%c0, %c0_0] : memref<128x16xf32, #tpu.memory_space<vmem>>, vector<128x16xf32>
    %c0_1 = arith.constant 0 : index
    %c0_2 = arith.constant 0 : index
    %1 = vector.load %arg2[%c0_1, %c0_2] : memref<16x128xf32, #tpu.memory_space<vmem>>, vector<16x128xf32>
    %cst = arith.constant dense<0.000000e+00> : vector<128x128xf32>
    %2 = tpu.matmul %0, %1, %cst {dimension_numbers = #tpu.dot_dimension_numbers<[1], [0], [0], [1], [0, 0, 1, 1], [], []>} : vector<128x16xf32>, vector<16x128xf32>, vector<128x128xf32> -> vector<128x128xf32>
    %c0_3 = arith.constant 0 : index
    %c0_4 = arith.constant 0 : index
    %3 = vector.load %arg3[%c0_3, %c0_4] : memref<1x128xf32, #tpu.memory_space<vmem>>, vector<1x128xf32>
    %4 = vector.broadcast %3 : vector<1x128xf32> to vector<128x128xf32>
    %5 = arith.addf %2, %4 : vector<128x128xf32>
    %cst_5 = arith.constant 0.000000e+00 : f32
    %6 = vector.broadcast %cst_5 : f32 to vector<128x128xf32>
    %7 = arith.maximumf %5, %6 : vector<128x128xf32>
    %c0_6 = arith.constant 0 : index
    %c0_7 = arith.constant 0 : index
    %8 = vector.load %arg4[%c0_6, %c0_7] : memref<128x128xf32, #tpu.memory_space<vmem>>, vector<128x128xf32>
    %cst_8 = arith.constant dense<0.000000e+00> : vector<128x128xf32>
    %9 = tpu.matmul %7, %8, %cst_8 {dimension_numbers = #tpu.dot_dimension_numbers<[1], [0], [0], [1], [0, 0, 1, 1], [], []>} : vector<128x128xf32>, vector<128x128xf32>, vector<128x128xf32> -> vector<128x128xf32>
    %c0_9 = arith.constant 0 : index
    %c0_10 = arith.constant 0 : index
    %10 = vector.load %arg5[%c0_9, %c0_10] : memref<1x128xf32, #tpu.memory_space<vmem>>, vector<1x128xf32>
    %11 = vector.broadcast %10 : vector<1x128xf32> to vector<128x128xf32>
    %12 = arith.addf %9, %11 : vector<128x128xf32>
    %13 = tpu.iota {dimensions = array<i32: 1>} : vector<128x128xi32>
    %c8_i32 = arith.constant 8 : i32
    %14 = vector.broadcast %c8_i32 : i32 to vector<128x128xi32>
    %15 = arith.cmpi slt, %13, %14 : vector<128x128xi32>
    %cst_11 = arith.constant 0xFF800000 : f32
    %16 = vector.broadcast %cst_11 : f32 to vector<128x128xf32>
    %17 = arith.select %15, %12, %16 : vector<128x128xi1>, vector<128x128xf32>
    %cst_12 = arith.constant dense<0xFF800000> : vector<128xf32>
    %18 = vector.multi_reduction <maximumf>, %17, %cst_12 [1] : vector<128x128xf32> to vector<128xf32>
    %19 = vector.shape_cast %18 : vector<128xf32> to vector<128x1xf32>
    %20 = vector.broadcast %19 : vector<128x1xf32> to vector<128x128xf32>
    %21 = arith.subf %17, %20 : vector<128x128xf32>
    %22 = math.exp %21 : vector<128x128xf32>
    %cst_13 = arith.constant dense<0.000000e+00> : vector<128xf32>
    %23 = vector.multi_reduction <add>, %22, %cst_13 [1] : vector<128x128xf32> to vector<128xf32>
    %24 = vector.shape_cast %23 : vector<128xf32> to vector<128x1xf32>
    %25 = tpu.reciprocal %24 {approx = true} : vector<128x1xf32> -> vector<128x1xf32>
    %26 = vector.broadcast %25 : vector<128x1xf32> to vector<128x128xf32>
    %27 = arith.mulf %22, %26 : vector<128x128xf32>
    %c0_14 = arith.constant 0 : index
    %c0_15 = arith.constant 0 : index
    %28 = vector.load %arg6[%c0_14, %c0_15] : memref<128x128xf32, #tpu.memory_space<vmem>>, vector<128x128xf32>
    tpu.vector_store %arg6[%c0_14, %c0_15], %27 {strides = array<i32>} : memref<128x128xf32, #tpu.memory_space<vmem>>, vector<128x128xf32>,
    return
  }
  func.func @transform_0(%arg0: i32) -> (i32, i32) {
    %c0_i32 = arith.constant 0 : i32
    %c0_i32_0 = arith.constant 0 : i32
    return %arg0, %c0_i32 : i32, i32
  }
  func.func @transform_1(%arg0: i32) -> (i32, i32) {
    %c0_i32 = arith.constant 0 : i32
    %c0_i32_0 = arith.constant 0 : i32
    %c0_i32_1 = arith.constant 0 : i32
    return %c0_i32, %c0_i32_0 : i32, i32
  }
  func.func @transform_2(%arg0: i32) -> (i32, i32) {
    %c0_i32 = arith.constant 0 : i32
    %c0_i32_0 = arith.constant 0 : i32
    %c0_i32_1 = arith.constant 0 : i32
    return %c0_i32, %c0_i32_0 : i32, i32
  }
  func.func @transform_3(%arg0: i32) -> (i32, i32) {
    %c0_i32 = arith.constant 0 : i32
    %c0_i32_0 = arith.constant 0 : i32
    %c0_i32_1 = arith.constant 0 : i32
    return %c0_i32, %c0_i32_0 : i32, i32
  }
  func.func @transform_4(%arg0: i32) -> (i32, i32) {
    %c0_i32 = arith.constant 0 : i32
    %c0_i32_0 = arith.constant 0 : i32
    %c0_i32_1 = arith.constant 0 : i32
    return %c0_i32, %c0_i32_0 : i32, i32
  }
  func.func @transform_5(%arg0: i32) -> (i32, i32) {
    %c0_i32 = arith.constant 0 : i32
    %c0_i32_0 = arith.constant 0 : i32
    return %arg0, %c0_i32 : i32, i32
  }
}

</mosaic_0001>

<bundles_post_ra>
// kernel: _policy_call.1
= control target key start
LH: loop header
LB: loop body
LE: loop exit
PB: predicated region body
PF: predicated region fallthrough
CT: control target
= control target key end

     0   :  { %10 = vsyncpa [#allocation3], 0  ;;  %s1713_s0 = inlined_call_operand.vmem [shape: f32[300,16], index: 0, kind: input, shape index: {}]   ;;  %s1714_s1 = inlined_call_operand.vmem [shape: f32[16,128], index: 1, kind: input, shape index: {}]   ;;  %s1715_s2 = inlined_call_operand.vmem [shape: f32[1,128], index: 2, kind: input, shape index: {}]   ;;  %s1716_s3 = inlined_call_operand.vmem [shape: f32[128,128], index: 3, kind: input, shape index: {}]   ;;  %s1717_s4 = inlined_call_operand.vmem [shape: f32[1,128], index: 4, kind: input, shape index: {}]   ;;  %s1718_s5 = inlined_call_operand.hbm [shape: f32[300,128], index: 5, kind: output, shape index: {}]  }
   0x1   :  { %12 = vsyncpa [#allocation3 + $0x1], 0  ;;  %s1336_s18 = smov 0   ;;  %s1338_s19 = smov 0  }
   0x2   :  { %s1340_s20 = smov 0   ;;  %s1342_s21 = smov 0  }
   0x3 LB: > { %s1357_s22 = sadd.s32 4294967295, %s1301_s21   ;;  %s914_s23 = sadd.s32 4294967294, %s1301_s21   ;;  %s1301_s21 = sphi %s1342_s21, %s1724_s21   ;;  %s1297_s20 = sphi %s1340_s20, %s1723_s20   ;;  %s1293_s19 = sphi %s1338_s19, %s1722_s19   ;;  %s1289_s18 = sphi %s1336_s18, %s1721_s18  }
   0x4   : > { %s1361_s24 = sadd.s32 1, %s1301_s21   ;;  %s135_s25 = sadd.s32 1, %s1297_s20 }
   0x5   : > { %s132_s26 = ssub.s32 %s1301_s21, %s1361_s24  ;;  %p145_p0 = scmp.ne.s32.totalorder %s1297_s20, %s1293_s19 }
   0x6   : > { %p133_p1 = scmp.eq.s32.totalorder %s132_s26, 0  ;;  %p146_p2 = scmp.eq.s32.totalorder %s1357_s22, 2 }
   0x7   : > { %p151_p3 = scmp.ne.s32.totalorder %s1293_s19, %s1289_s18  ;;  %p152_p4 = scmp.eq.s32.totalorder %s914_s23, 2 }
   0x8   : > { %s1372_s27 = scalar_select %p133_p1, %s1297_s20, %s135_s25  }
   0x9   : > { %p1374_p5 = por %p146_p2, %p145_p0  ;;  %p1378_p6 = por %p152_p4, %p151_p3 }
   0xa   : > { %p917_p7 = scmp.ge.s32.totalorder %s1301_s21, 1  ;;  %p199_p8 = scmp.lt.s32.totalorder %s1301_s21, 4 }
   0xc   : > { %p200_p9 = pnand %p917_p7, %p199_p8 }
   0xd   : > { %v266_v0 = vld [vmem:[%s1714_s1] sm:$0xff] (!%p200_p9)  ;;  %v267_v1 = vld [vmem:[%s1714_s1 + $0x8] sm:$0xff] (!%p200_p9)  ;;  %s1391_s9 = sshll.u32 (!%p200_p9), %s1357_s22, 4  ;;  %v487_v5 = vld [vmem:[%s1716_s3 + $0x10] sm:$0xff] (!%p200_p9)  ;;  %vm275_vm0 = vcmask (!%p200_p9), 130048   ;;  %s228_s30 = sand.u32 (!%p200_p9), 1, %s1293_s19  }
   0xe   : > { %203 = sbr.rel (%p200_p9) target bundleno = 834 (0x342), region = 40  ;;  %v485_v2 = vld [vmem:[%s1716_s3] sm:$0xff] (!%p200_p9)  ;;  %v1083_v3 = vpack.c.bf16 (!%p200_p9), %v267_v1, %v266_v0  ;;  %p236_p10 = scmp.lt.s32.totalorder (!%p200_p9), %s1391_s9, 37  ;;  %v486_v4 = vld [vmem:[%s1716_s3 + $0x8] sm:$0xff] (!%p200_p9)  ;;  %v488_v6 = vld [vmem:[%s1716_s3 + $0x18] sm:$0xff] (!%p200_p9) }
   0xf   : > { %v1087_v7 = vpack.c.bf16 (!%p200_p9), %v486_v4, %v485_v2  ;;  %v1091_v8 = vpack.c.bf16 (!%p200_p9), %v488_v6, %v487_v5  ;;  %v489_v9 = vld [vmem:[%s1716_s3 + $0x20] sm:$0xff] (!%p200_p9)  ;;  %v490_v10 = vld [vmem:[%s1716_s3 + $0x28] sm:$0xff] (!%p200_p9)  ;;  %v491_v16 = vld [vmem:[%s1716_s3 + $0x30] sm:$0xff] (!%p200_p9)  ;;  %s918_s7 = sshll.u32 (!%p200_p9), %s228_s30, 7  ;;  %s1652_s10 = scalar_lea.sflag (!%p200_p9), [#allocation3], %s228_s30 }
  0x10   : > { %1084 = vmatprep.subr.bf16.mxu0 (!%p200_p9), %v1083_v3  ;;  %v1095_v14 = vpack.c.bf16 (!%p200_p9), %v490_v10, %v489_v9  ;;  %v492_v17 = vld [vmem:[%s1716_s3 + $0x38] sm:$0xff] (!%p200_p9)  ;;  %v493_v21 = vld [vmem:[%s1716_s3 + $0x40] sm:$0xff] (!%p200_p9)  ;;  %v494_v22 = vld [vmem:[%s1716_s3 + $0x48] sm:$0xff] (!%p200_p9)  ;;  %s1617_s8 = scalar_lea.vmem (!%p200_p9), [#allocation2], %s918_s7 }
  0x11   : > { %1086 = vmatpush3.bf16.msra.mxu0 (!%p200_p9), %v1083_v3  ;;  %1119 = vmatprep.subr.bf16.mxu1 (!%p200_p9), %v1087_v7  ;;  %v1099_v19 = vpack.c.bf16 (!%p200_p9), %v492_v17, %v491_v16  ;;  %v1103_v24 = vpack.c.bf16 (!%p200_p9), %v494_v22, %v493_v21  ;;  %v495_v26 = vld [vmem:[%s1716_s3 + $0x50] sm:$0xff] (!%p200_p9)  ;;  %v496_v27 = vld [vmem:[%s1716_s3 + $0x58] sm:$0xff] (!%p200_p9)  ;;  %v497_v31 = vld [vmem:[%s1716_s3 + $0x60] sm:$0xff] (!%p200_p9) }
  0x12   : > { %1088 = vmatprep.subr.bf16.mxu0 (!%p200_p9), %v1087_v7  ;;  %1127 = vmatpush3.bf16.msra.mxu1 (!%p200_p9), %v1087_v7  ;;  %v1107_v29 = vpack.c.bf16 (!%p200_p9), %v496_v27, %v495_v26  ;;  %v498_v32 = vld [vmem:[%s1716_s3 + $0x68] sm:$0xff] (!%p200_p9)  ;;  %v499_v40 = vld [vmem:[%s1716_s3 + $0x70] sm:$0xff] (!%p200_p9)  ;;  %v500_v41 = vld [vmem:[%s1716_s3 + $0x78] sm:$0xff] (!%p200_p9) }
  0x13   : > { %1120 = vmatprep.subr.bf16.mxu1 (!%p200_p9), %v1091_v8  ;;  %v1111_v34 = vpack.c.bf16 (!%p200_p9), %v498_v32, %v497_v31  ;;  %v1115_v42 = vpack.c.bf16 (!%p200_p9), %v500_v41, %v499_v40  ;;  %v921_v43 = vld [vmem:[%s1715_s2] ss:$0 sm:$0xff] (!%p200_p9) }
  0x15   : > { %s237_s23 = scalar_select %p236_p10, %s1391_s9, 37 }
  0x16   : > { %1128 = vmatpush3.bf16.msra.mxu1 %v1091_v8  ;;  %s841_s11 = ssub.s32 (%p1374_p5), 38, %s1391_s9 }
  0x17   : > { %s920_s25 = sshll.u32 %s237_s23, 3  ;;  %1121 = vmatprep.subr.bf16.mxu1 %v1095_v14  ;;  %p842_p11 = scmp.lt.s32.totalorder (%p1374_p5), %s841_s11, 16 }
  0x18   : > { %s1410_s6 = scalar_lea.vmem %s1713_s0, %s920_s25 }
  0x19   : > { %v250_v11 = vld [vmem:[%s1410_s6] sm:$0xff]  ;;  %v251_v12 = vld [vmem:[%s1410_s6 + $0x8] sm:$0xff]  ;;  %v252_v13 = vld [vmem:[%s1410_s6 + $0x10] sm:$0xff] }
  0x1a   : > { %1003 = vmatprep.mubr.msk.f32.mxu0 %vm275_vm0, %v250_v11  ;;  %v253_v15 = vld [vmem:[%s1410_s6 + $0x18] sm:$0xff]  ;;  %v254_v18 = vld [vmem:[%s1410_s6 + $0x20] sm:$0xff]  ;;  %1129 = vmatpush3.bf16.msra.mxu1 %v1095_v14  ;;  %v255_v20 = vld [vmem:[%s1410_s6 + $0x28] sm:$0xff] }
  0x1b   : > { %1004 = vmatmul.mubr.msk.f32.vlgmr.msra.gmra.mrb[0].mxu0 %vm275_vm0, %v251_v12  ;;  %v256_v23 = vld [vmem:[%s1410_s6 + $0x30] sm:$0xff]  ;;  %1122 = vmatprep.subr.bf16.mxu1 %v1099_v19  ;;  %v257_v25 = vld [vmem:[%s1410_s6 + $0x38] sm:$0xff]  ;;  %v258_v28 = vld [vmem:[%s1410_s6 + $0x40] sm:$0xff] }
  0x1c   : > { %1006 = vmatprep.mubr.msk.f32.mxu0 %vm275_vm0, %v252_v13  ;;  %1090 = vmatpush3.bf16.msra.mxu0 %v1087_v7  ;;  %v259_v30 = vld [vmem:[%s1410_s6 + $0x48] sm:$0xff]  ;;  %v260_v33 = vld [vmem:[%s1410_s6 + $0x50] sm:$0xff]  ;;  %v261_v35 = vld [vmem:[%s1410_s6 + $0x58] sm:$0xff] }
  0x1d   : > { %1092 = vmatprep.subr.bf16.mxu0 %v1091_v8  ;;  %v262_v36 = vld [vmem:[%s1410_s6 + $0x60] sm:$0xff]  ;;  %v263_v37 = vld [vmem:[%s1410_s6 + $0x68] sm:$0xff]  ;;  %v264_v38 = vld [vmem:[%s1410_s6 + $0x70] sm:$0xff] }
  0x1e   : > { %1130 = vmatpush3.bf16.msra.mxu1 %v1099_v19  ;;  %v265_v39 = vld [vmem:[%s1410_s6 + $0x78] sm:$0xff] }
  0x1f   : > { %1007 = vmatmul.mubr.msk.f32.gmra.mrb[2].mxu0 %vm275_vm0, %v253_v15  ;;  %1123 = vmatprep.subr.bf16.mxu1 %v1103_v24 }
  0x20   : > { %1009 = vmatprep.mubr.msk.f32.mxu0 %vm275_vm0, %v254_v18  ;;  %1094 = vmatpush3.bf16.msra.mxu0 %v1091_v8 }
  0x21   : > { %1096 = vmatprep.subr.bf16.mxu0 %v1095_v14 }
  0x22   : > { %1131 = vmatpush3.bf16.msra.mxu1 %v1103_v24 }
  0x23   : > { %1010 = vmatmul.mubr.msk.f32.gmra.mrb[4].mxu0 %vm275_vm0, %v255_v20  ;;  %1124 = vmatprep.subr.bf16.mxu1 %v1107_v29 }
  0x24   : > { %1012 = vmatprep.mubr.msk.f32.mxu0 %vm275_vm0, %v256_v23  ;;  %1098 = vmatpush3.bf16.msra.mxu0 %v1095_v14 }
  0x25   : > { %1100 = vmatprep.subr.bf16.mxu0 %v1099_v19 }
  0x26   : > { %1132 = vmatpush3.bf16.msra.mxu1 %v1107_v29 }
  0x27   : > { %1013 = vmatmul.mubr.msk.f32.gmra.mrb[6].mxu0 %vm275_vm0, %v257_v25  ;;  %1125 = vmatprep.subr.bf16.mxu1 %v1111_v34 }
  0x28   : > { %1015 = vmatprep.mubr.msk.f32.mxu0 %vm275_vm0, %v258_v28  ;;  %1102 = vmatpush3.bf16.msra.mxu0 %v1099_v19  ;;  %v653_v28 = vlaneseq }
  0x29   : > { %1104 = vmatprep.subr.bf16.mxu0 %v1103_v24 }
  0x2a   : > { %1133 = vmatpush3.bf16.msra.mxu1 %v1111_v34 }
  0x2b   : > { %1016 = vmatmul.mubr.msk.f32.gmra.mrb[8].mxu0 %vm275_vm0, %v259_v30  ;;  %1126 = vmatprep.subr.bf16.mxu1 %v1115_v42  ;;  %v938_v30 = vld [vmem:[%s1717_s4] ss:$0 sm:$0xff] }
  0x2c   : > { %1018 = vmatprep.mubr.msk.f32.mxu0 %vm275_vm0, %v260_v33  ;;  %1106 = vmatpush3.bf16.msra.mxu0 %v1103_v24 }
  0x2d   : > { %1108 = vmatprep.subr.bf16.mxu0 %v1107_v29 }
  0x2e   : > { %1134 = vmatpush3.bf16.msra.mxu1 %v1115_v42 }
  0x2f   : > { %1019 = vmatmul.mubr.msk.f32.gmra.mrb[10].mxu0 %vm275_vm0, %v261_v35 }
  0x30   : > { %1021 = vmatprep.mubr.msk.f32.mxu0 %vm275_vm0, %v262_v36  ;;  %1110 = vmatpush3.bf16.msra.mxu0 %v1107_v29  ;;  %v1483_v29 = vand.u32 127, %v653_v28 }
  0x31   : > { %1112 = vmatprep.subr.bf16.mxu0 %v1111_v34 }
  0x32   : > { %vm655_vm1 = vcmp.lt.s32.totalorder %v1483_v29, 8 }
  0x33   : > { %1022 = vmatmul.mubr.msk.f32.gmra.mrb[12].mxu0 %vm275_vm0, %v263_v37 }
  0x34   : > { %1024 = vmatprep.mubr.msk.f32.mxu0 %vm275_vm0, %v264_v38  ;;  %1114 = vmatpush3.bf16.msra.mxu0 %v1111_v34 }
  0x35   : > { %1116 = vmatprep.subr.bf16.mxu0 %v1115_v42 }
  0x37   : > { %1025 = vmatmul.mubr.msk.f32.gmra.mrb[14].mxu0 %vm275_vm0, %v265_v39 }
  0x38   : > { %1118 = vmatpush3.bf16.msra.mxu0 %v1115_v42 }
  0xee   : > { %v1005_v44 = vpop.f32.mrb[0].mxu0 }
  0xef   : > { %v396_v45 = vadd.f32 %v1005_v44, %v921_v43  ;;  %v390_v46 = vpop.f32.mrb[1].mxu0 }
  0xf0   : > { %v391_v47 = vadd.f32 %v921_v43, %v390_v46 }
  0xf1   : > { %v470_v50 = vmax.f32 %v396_v45, 0.0 }
  0xf2   : > { %v469_v48 = vmax.f32 %v391_v47, 0.0  ;;  %v1008_v49 = vpop.f32.mrb[2].mxu0 }
  0xf3   : > { %v406_v51 = vadd.f32 %v1008_v49, %v921_v43  ;;  %v400_v52 = vpop.f32.mrb[3].mxu0 }
  0xf4   : > { %v401_v53 = vadd.f32 %v921_v43, %v400_v52  ;;  %1059 = vmatprep.mubr.f32.mxu0 %v469_v48 }
  0xf5   : > { %1060 = vmatmul.mubr.f32.vlgmr.msra.gmra.mrb[16].mxu0 %v470_v50  ;;  %v472_v56 = vmax.f32 %v406_v51, 0.0 }
  0xf6   : > { %v471_v54 = vmax.f32 %v401_v53, 0.0  ;;  %v1011_v55 = vpop.f32.mrb[4].mxu0 }
  0xf7   : > { %v416_v57 = vadd.f32 %v1011_v55, %v921_v43  ;;  %v410_v58 = vpop.f32.mrb[5].mxu0 }
  0xf8   : > { %v411_v59 = vadd.f32 %v921_v43, %v410_v58  ;;  %1062 = vmatprep.mubr.f32.mxu0 %v471_v54 }
  0xf9   : > { %v474_v60 = vmax.f32 %v416_v57, 0.0  ;;  %1063 = vmatmul.mubr.f32.gmra.mrb[18].mxu0 %v472_v56 }
  0xfa   : > { %v473_v61 = vmax.f32 %v411_v59, 0.0  ;;  %v1014_v62 = vpop.f32.mrb[6].mxu0 }
  0xfb   : > { %v426_v63 = vadd.f32 %v1014_v62, %v921_v43  ;;  %v420_v0 = vpop.f32.mrb[7].mxu0 }
  0xfc   : > { %1065 = vmatprep.mubr.f32.mxu0 %v473_v61  ;;  %v421_v1 = vadd.f32 %v921_v43, %v420_v0 }
  0xfd   : > { %v476_v2 = vmax.f32 %v426_v63, 0.0  ;;  %1066 = vmatmul.mubr.f32.gmra.mrb[20].mxu0 %v474_v60 }
  0xfe   : > { %v1017_v3 = vpop.f32.mrb[8].mxu0  ;;  %v475_v4 = vmax.f32 %v421_v1, 0.0 }
  0xff   : > { %v436_v5 = vadd.f32 %v1017_v3, %v921_v43  ;;  %v430_v6 = vpop.f32.mrb[9].mxu0 }
 0x100   : > { %v431_v7 = vadd.f32 %v921_v43, %v430_v6  ;;  %1068 = vmatprep.mubr.f32.mxu1 %v475_v4 }
 0x101   : > { %v478_v8 = vmax.f32 %v436_v5, 0.0  ;;  %1069 = vmatmul.mubr.f32.vlgmr.msra.gmra.mrb[0].mxu1 %v476_v2 }
 0x102   : > { %v477_v9 = vmax.f32 %v431_v7, 0.0  ;;  %v1020_v10 = vpop.f32.mrb[10].mxu0 }
 0x103   : > { %v446_v11 = vadd.f32 %v1020_v10, %v921_v43  ;;  %v440_v12 = vpop.f32.mrb[11].mxu0 }
 0x104   : > { %v441_v13 = vadd.f32 %v921_v43, %v440_v12  ;;  %1071 = vmatprep.mubr.f32.mxu1 %v477_v9 }
 0x105   : > { %v480_v14 = vmax.f32 %v446_v11, 0.0  ;;  %1072 = vmatmul.mubr.f32.gmra.mrb[2].mxu1 %v478_v8 }
 0x106   : > { %v479_v15 = vmax.f32 %v441_v13, 0.0  ;;  %v1023_v16 = vpop.f32.mrb[12].mxu0 }
 0x107   : > { %v456_v17 = vadd.f32 %v1023_v16, %v921_v43  ;;  %v450_v18 = vpop.f32.mrb[13].mxu0 }
 0x108   : > { %v451_v19 = vadd.f32 %v921_v43, %v450_v18  ;;  %1074 = vmatprep.mubr.f32.mxu1 %v479_v15 }
 0x109   : > { %v482_v20 = vmax.f32 %v456_v17, 0.0  ;;  %1075 = vmatmul.mubr.f32.gmra.mrb[4].mxu1 %v480_v14 }
 0x10a   : > { %v481_v21 = vmax.f32 %v451_v19, 0.0  ;;  %v1026_v22 = vpop.f32.mrb[14].mxu0 }
 0x10b   : > { %v466_v23 = vadd.f32 %v1026_v22, %v921_v43  ;;  %v460_v24 = vpop.f32.mrb[15].mxu0 }
 0x10c   : > { %v461_v25 = vadd.f32 %v921_v43, %v460_v24  ;;  %1077 = vmatprep.mubr.f32.mxu1 %v481_v21 }
 0x10d   : > { %v484_v26 = vmax.f32 %v466_v23, 0.0  ;;  %1078 = vmatmul.mubr.f32.gmra.mrb[6].mxu1 %v482_v20 }
 0x10e   : > { %v483_v27 = vmax.f32 %v461_v25, 0.0 }
 0x110   : > { %1080 = vmatprep.mubr.f32.mxu1 %v483_v27 }
 0x111   : > { %1081 = vmatmul.mubr.f32.gmra.mrb[8].mxu1 %v484_v26 }
 0x1c8   : > { %v1061_v31 = vpop.f32.mrb[16].mxu0 }
 0x1c9   : > { %v580_v32 = vadd.f32 %v1061_v31, %v938_v30  ;;  %v574_v33 = vpop.f32.mrb[17].mxu0 }
 0x1ca   : > { %v575_v34 = vadd.f32 %v938_v30, %v574_v33 }
 0x1cb   : > { %v657_v35 = vsel %vm655_vm1, %v580_v32, -inf }
 0x1cc   : > { %674 = vmax.xlane.f32.xlu0 %v657_v35  ;;  %v1064_v36 = vpop.f32.mrb[18].mxu0  ;;  %v656_v41 = vsel %vm655_vm1, %v575_v34, -inf }
 0x1cd   : > { %v590_v37 = vadd.f32 %v1064_v36, %v938_v30  ;;  %v584_v38 = vpop.f32.mrb[19].mxu0 }
 0x1ce   : > { %v585_v39 = vadd.f32 %v938_v30, %v584_v38 }
 0x1cf   : > { %v659_v40 = vsel %vm655_vm1, %v590_v37, -inf }
 0x1d0   : > { %678 = vmax.xlane.f32.xlu1 %v659_v40  ;;  %v1067_v42 = vpop.f32.mrb[20].mxu0  ;;  %672 = vmax.xlane.f32.xlu0 %v656_v41  ;;  %v658_v46 = vsel %vm655_vm1, %v585_v39, -inf }
 0x1d1   : > { %v594_v43 = vpop.f32.mrb[21].mxu0  ;;  %v600_v45 = vadd.f32 %v1067_v42, %v938_v30 }
 0x1d2   : > { %v595_v44 = vadd.f32 %v938_v30, %v594_v43 }
 0x1d3   : > { %v661_v52 = vsel %vm655_vm1, %v600_v45, -inf }
 0x1d4   : > { %v1070_v47 = vpop.f32.mrb[0].mxu1  ;;  %676 = vmax.xlane.f32.xlu1 %v658_v46  ;;  %v1499_v48 = vsel %vm655_vm1, %v595_v44, -inf }
 0x1d5   : > { %v604_v49 = vpop.f32.mrb[1].mxu1  ;;  %680 = vmax.xlane.f32.xlu0 %v1499_v48  ;;  %v610_v51 = vadd.f32 %v1070_v47, %v938_v30 }
 0x1d6   : > { %v605_v50 = vadd.f32 %v938_v30, %v604_v49 }
 0x1d7   : > { %v1511_v58 = vsel %vm655_vm1, %v610_v51, -inf }
 0x1d8   : > { %v1073_v53 = vpop.f32.mrb[2].mxu1  ;;  %682 = vmax.xlane.f32.xlu1 %v661_v52  ;;  %v1506_v54 = vsel %vm655_vm1, %v605_v50, -inf }
 0x1d9   : > { %v614_v55 = vpop.f32.mrb[3].mxu1  ;;  %684 = vmax.xlane.f32.xlu0 %v1506_v54  ;;  %v620_v57 = vadd.f32 %v1073_v53, %v938_v30 }
 0x1da   : > { %v615_v56 = vadd.f32 %v938_v30, %v614_v55 }
 0x1db   : > { %v1521_v0 = vsel %vm655_vm1, %v620_v57, -inf }
 0x1dc   : > { %v1076_v59 = vpop.f32.mrb[4].mxu1  ;;  %686 = vmax.xlane.f32.xlu1 %v1511_v58  ;;  %v1516_v60 = vsel %vm655_vm1, %v615_v56, -inf }
 0x1dd   : > { %v624_v61 = vpop.f32.mrb[5].mxu1  ;;  %688 = vmax.xlane.f32.xlu0 %v1516_v60  ;;  %v630_v63 = vadd.f32 %v1076_v59, %v938_v30 }
 0x1de   : > { %v625_v62 = vadd.f32 %v938_v30, %v624_v61 }
 0x1df   : > { %v1531_v6 = vsel %vm655_vm1, %v630_v63, -inf }
 0x1e0   : > { %v1079_v1 = vpop.f32.mrb[6].mxu1  ;;  %690 = vmax.xlane.f32.xlu1 %v1521_v0  ;;  %v1526_v2 = vsel %vm655_vm1, %v625_v62, -inf }
 0x1e1   : > { %v634_v3 = vpop.f32.mrb[7].mxu1  ;;  %692 = vmax.xlane.f32.xlu0 %v1526_v2  ;;  %v640_v5 = vadd.f32 %v1079_v1, %v938_v30 }
 0x1e2   : > { %v635_v4 = vadd.f32 %v938_v30, %v634_v3 }
 0x1e3   : > { %v1541_v12 = vsel %vm655_vm1, %v640_v5, -inf }
 0x1e4   : > { %v1082_v7 = vpop.f32.mrb[8].mxu1  ;;  %694 = vmax.xlane.f32.xlu1 %v1531_v6  ;;  %v1536_v8 = vsel %vm655_vm1, %v635_v4, -inf }
 0x1e5   : > { %v644_v9 = vpop.f32.mrb[9].mxu1  ;;  %696 = vmax.xlane.f32.xlu0 %v1536_v8  ;;  %v650_v11 = vadd.f32 %v1082_v7, %v938_v30 }
 0x1e6   : > { %v645_v10 = vadd.f32 %v938_v30, %v644_v9 }
 0x1e7   : > { %v1551_v14 = vsel %vm655_vm1, %v650_v11, -inf }
 0x1e8   : > { %698 = vmax.xlane.f32.xlu1 %v1541_v12  ;;  %v1546_v13 = vsel %vm655_vm1, %v645_v10, -inf }
 0x1e9   : > { %700 = vmax.xlane.f32.xlu0 %v1546_v13 }
 0x1ec   : > { %702 = vmax.xlane.f32.xlu1 %v1551_v14 }
 0x259   : > { %v675_v15 = vpop.xlane.xlu0 %674 }
 0x25a   : > { %v705_v16 = vsub.f32 %v657_v35, %v675_v15 }
 0x25c   : > { %v722_v17 = vmul.f32 1.442695, %v705_v16 }
 0x25d   : > { %v679_v18 = vpop.xlane.xlu1 %678  ;;  %v673_v19 = vpop.xlane.xlu0 %672 }
 0x25e   : > { %1175 = vpow2.f32 %v722_v17  ;;  %v707_v20 = vsub.f32 %v659_v40, %v679_v18  ;;  %v704_v21 = vsub.f32 %v656_v41, %v673_v19 }
 0x260   : > { %v726_v22 = vmul.f32 1.442695, %v707_v20  ;;  %v720_v23 = vmul.f32 1.442695, %v704_v21 }
 0x261   : > { %v677_v24 = vpop.xlane.xlu1 %676 }
 0x262   : > { %1177 = vpow2.f32 %v726_v22  ;;  %v706_v25 = vsub.f32 %v658_v46, %v677_v24  ;;  %v681_v26 = vpop.xlane.xlu0 %680 }
 0x263   : > { %1179 = vpow2.f32 %v720_v23  ;;  %v708_v27 = vsub.f32 %v1499_v48, %v681_v26 }
 0x264   : > { %v724_v28 = vmul.f32 1.442695, %v706_v25 }
 0x265   : > { %v683_v29 = vpop.xlane.xlu1 %682  ;;  %v728_v32 = vmul.f32 1.442695, %v708_v27 }
 0x266   : > { %1181 = vpow2.f32 %v724_v28  ;;  %v709_v30 = vsub.f32 %v661_v52, %v683_v29  ;;  %v685_v31 = vpop.xlane.xlu0 %684 }
 0x267   : > { %v710_v33 = vsub.f32 %v1506_v54, %v685_v31 }
 0x268   : > { %v1556_v34 = vpop.eup %1175  ;;  %v730_v35 = vmul.f32 1.442695, %v709_v30 }
 0x269   : > { %754 = vadd.xlane.f32.xlu1 %v1556_v34  ;;  %v687_v36 = vpop.xlane.xlu1 %686  ;;  %v732_v39 = vmul.f32 1.442695, %v710_v33 }
 0x26a   : > { %1183 = vpow2.f32 %v730_v35  ;;  %v711_v37 = vsub.f32 %v1511_v58, %v687_v36  ;;  %v689_v38 = vpop.xlane.xlu0 %688 }
 0x26b   : > { %1185 = vpow2.f32 %v728_v32  ;;  %v712_v40 = vsub.f32 %v1516_v60, %v689_v38 }
 0x26c   : > { %v1561_v41 = vpop.eup %1177  ;;  %v734_v42 = vmul.f32 1.442695, %v711_v37 }
 0x26d   : > { %v1563_v43 = vpop.eup %1179  ;;  %758 = vadd.xlane.f32.xlu1 %v1561_v41  ;;  %v691_v44 = vpop.xlane.xlu1 %690  ;;  %v736_v47 = vmul.f32 1.442695, %v712_v40 }
 0x26e   : > { %1187 = vpow2.f32 %v734_v42  ;;  %v713_v45 = vsub.f32 %v1521_v0, %v691_v44  ;;  %752 = vadd.xlane.f32.xlu0 %v1563_v43  ;;  %v693_v46 = vpop.xlane.xlu0 %692 }
 0x26f   : > { %1189 = vpow2.f32 %v732_v39  ;;  %v714_v48 = vsub.f32 %v1526_v2, %v693_v46 }
 0x270   : > { %v1569_v49 = vpop.eup %1181  ;;  %v738_v50 = vmul.f32 1.442695, %v713_v45 }
 0x271   : > { %v695_v51 = vpop.xlane.xlu1 %694  ;;  %v740_v54 = vmul.f32 1.442695, %v714_v48 }
 0x272   : > { %1191 = vpow2.f32 %v738_v50  ;;  %v715_v52 = vsub.f32 %v1531_v6, %v695_v51  ;;  %756 = vadd.xlane.f32.xlu0 %v1569_v49  ;;  %v697_v53 = vpop.xlane.xlu0 %696 }
 0x273   : > { %1193 = vpow2.f32 %v736_v47  ;;  %v716_v55 = vsub.f32 %v1536_v8, %v697_v53 }
 0x274   : > { %v1574_v56 = vpop.eup %1183  ;;  %v742_v57 = vmul.f32 1.442695, %v715_v52 }
 0x275   : > { %v1576_v58 = vpop.eup %1185  ;;  %762 = vadd.xlane.f32.xlu1 %v1574_v56  ;;  %v699_v59 = vpop.xlane.xlu1 %698  ;;  %v744_v62 = vmul.f32 1.442695, %v716_v55 }
 0x276   : > { %1195 = vpow2.f32 %v742_v57  ;;  %v717_v60 = vsub.f32 %v1541_v12, %v699_v59  ;;  %760 = vadd.xlane.f32.xlu0 %v1576_v58  ;;  %v701_v61 = vpop.xlane.xlu0 %700 }
 0x277   : > { %1197 = vpow2.f32 %v740_v54  ;;  %v718_v63 = vsub.f32 %v1546_v13, %v701_v61 }
 0x278   : > { %v1582_v0 = vpop.eup %1187  ;;  %v746_v1 = vmul.f32 1.442695, %v717_v60 }
 0x279   : > { %v1584_v2 = vpop.eup %1189  ;;  %766 = vadd.xlane.f32.xlu1 %v1582_v0  ;;  %v703_v3 = vpop.xlane.xlu1 %702  ;;  %v748_v5 = vmul.f32 1.442695, %v718_v63 }
 0x27a   : > { %1199 = vpow2.f32 %v746_v1  ;;  %v719_v4 = vsub.f32 %v1551_v14, %v703_v3  ;;  %764 = vadd.xlane.f32.xlu0 %v1584_v2 }
 0x27b   : > { %1201 = vpow2.f32 %v744_v62 }
 0x27c   : > { %v1589_v6 = vpop.eup %1191  ;;  %v750_v7 = vmul.f32 1.442695, %v719_v4 }
 0x27d   : > { %v1591_v8 = vpop.eup %1193  ;;  %770 = vadd.xlane.f32.xlu1 %v1589_v6 }
 0x27e   : > { %1203 = vpow2.f32 %v750_v7  ;;  %768 = vadd.xlane.f32.xlu0 %v1591_v8 }
 0x27f   : > { %1205 = vpow2.f32 %v748_v5 }
 0x280   : > { %v1595_v9 = vpop.eup %1195 }
 0x281   : > { %v1597_v10 = vpop.eup %1197  ;;  %774 = vadd.xlane.f32.xlu1 %v1595_v9 }
 0x282   : > { %772 = vadd.xlane.f32.xlu0 %v1597_v10 }
 0x284   : > { %v1602_v11 = vpop.eup %1199 }
 0x285   : > { %v1604_v12 = vpop.eup %1201  ;;  %778 = vadd.xlane.f32.xlu1 %v1602_v11 }
 0x286   : > { %776 = vadd.xlane.f32.xlu0 %v1604_v12 }
 0x288   : > { %v1608_v13 = vpop.eup %1203 }
 0x289   : > { %v1610_v14 = vpop.eup %1205  ;;  %782 = vadd.xlane.f32.xlu1 %v1608_v13 }
 0x28a   : > { %780 = vadd.xlane.f32.xlu0 %v1610_v14 }
 0x2f6   : > { %v755_v15 = vpop.xlane.xlu1 %754 }
 0x2f7   : > { %1207 = vrcp.f32 %v755_v15 }
 0x2fa   : > { %v759_v16 = vpop.xlane.xlu1 %758 }
 0x2fb   : > { %1209 = vrcp.f32 %v759_v16  ;;  %v753_v17 = vpop.xlane.xlu0 %752 }
 0x2fc   : > { %1211 = vrcp.f32 %v753_v17 }
 0x2ff   : > { %v757_v18 = vpop.xlane.xlu0 %756 }
 0x300   : > { %1213 = vrcp.f32 %v757_v18 }
 0x301   : > { %v1208_v19 = vpop.eup %1207 }
 0x302   : > { %v801_v20 = vmul.f32 %v1208_v19, %v1556_v34  ;;  %v763_v21 = vpop.xlane.xlu1 %762 }
 0x303   : > { %1215 = vrcp.f32 %v763_v21  ;;  %v761_v22 = vpop.xlane.xlu0 %760 }
 0x304   : > { %817 = vst [vmem:[%s1617_s8 + $0x8] sm:$0xff] %v801_v20  ;;  %1217 = vrcp.f32 %v761_v22 }
 0x305   : > { %v1210_v23 = vpop.eup %1209 }
 0x306   : > { %v1212_v24 = vpop.eup %1211  ;;  %v803_v25 = vmul.f32 %v1210_v23, %v1561_v41  ;;  %v767_v26 = vpop.xlane.xlu1 %766 }
 0x307   : > { %v800_v27 = vmul.f32 %v1212_v24, %v1563_v43  ;;  %1219 = vrcp.f32 %v767_v26  ;;  %v765_v28 = vpop.xlane.xlu0 %764 }
 0x308   : > { %819 = vst [vmem:[%s1617_s8 + $0x18] sm:$0xff] %v803_v25  ;;  %1221 = vrcp.f32 %v765_v28 }
 0x309   : > { %816 = vst [vmem:[%s1617_s8] sm:$0xff] %v800_v27 }
 0x30a   : > { %v1214_v29 = vpop.eup %1213  ;;  %v771_v30 = vpop.xlane.xlu1 %770 }
 0x30b   : > { %v802_v31 = vmul.f32 %v1214_v29, %v1569_v49  ;;  %1223 = vrcp.f32 %v771_v30  ;;  %v769_v32 = vpop.xlane.xlu0 %768 }
 0x30c   : > { %1225 = vrcp.f32 %v769_v32 }
 0x30d   : > { %v1216_v33 = vpop.eup %1215  ;;  %818 = vst [vmem:[%s1617_s8 + $0x10] sm:$0xff] %v802_v31 }
 0x30e   : > { %v1218_v34 = vpop.eup %1217  ;;  %v805_v35 = vmul.f32 %v1216_v33, %v1574_v56  ;;  %v775_v36 = vpop.xlane.xlu1 %774 }
 0x30f   : > { %v804_v37 = vmul.f32 %v1218_v34, %v1576_v58  ;;  %1227 = vrcp.f32 %v775_v36  ;;  %v773_v38 = vpop.xlane.xlu0 %772 }
 0x310   : > { %821 = vst [vmem:[%s1617_s8 + $0x28] sm:$0xff] %v805_v35  ;;  %1229 = vrcp.f32 %v773_v38 }
 0x311   : > { %v1220_v39 = vpop.eup %1219  ;;  %820 = vst [vmem:[%s1617_s8 + $0x20] sm:$0xff] %v804_v37 }
 0x312   : > { %v1222_v40 = vpop.eup %1221  ;;  %v807_v41 = vmul.f32 %v1220_v39, %v1582_v0  ;;  %v779_v42 = vpop.xlane.xlu1 %778 }
 0x313   : > { %v806_v43 = vmul.f32 %v1222_v40, %v1584_v2  ;;  %1231 = vrcp.f32 %v779_v42  ;;  %v777_v44 = vpop.xlane.xlu0 %776 }
 0x314   : > { %823 = vst [vmem:[%s1617_s8 + $0x38] sm:$0xff] %v807_v41  ;;  %1233 = vrcp.f32 %v777_v44 }
 0x315   : > { %v1224_v45 = vpop.eup %1223  ;;  %822 = vst [vmem:[%s1617_s8 + $0x30] sm:$0xff] %v806_v43 }
 0x316   : > { %v1226_v46 = vpop.eup %1225  ;;  %v809_v47 = vmul.f32 %v1224_v45, %v1589_v6  ;;  %v783_v48 = vpop.xlane.xlu1 %782 }
 0x317   : > { %v808_v49 = vmul.f32 %v1226_v46, %v1591_v8  ;;  %1235 = vrcp.f32 %v783_v48  ;;  %v781_v50 = vpop.xlane.xlu0 %780 }
 0x318   : > { %825 = vst [vmem:[%s1617_s8 + $0x48] sm:$0xff] %v809_v47  ;;  %1237 = vrcp.f32 %v781_v50 }
 0x319   : > { %v1228_v51 = vpop.eup %1227  ;;  %824 = vst [vmem:[%s1617_s8 + $0x40] sm:$0xff] %v808_v49 }
 0x31a   : > { %v1230_v52 = vpop.eup %1229  ;;  %v811_v53 = vmul.f32 %v1228_v51, %v1595_v9 }
 0x31b   : > { %v810_v54 = vmul.f32 %v1230_v52, %v1597_v10 }
 0x31c   : > { %827 = vst [vmem:[%s1617_s8 + $0x58] sm:$0xff] %v811_v53 }
 0x31d   : > { %v1232_v55 = vpop.eup %1231  ;;  %826 = vst [vmem:[%s1617_s8 + $0x50] sm:$0xff] %v810_v54 }
 0x31e   : > { %v1234_v56 = vpop.eup %1233  ;;  %v813_v57 = vmul.f32 %v1232_v55, %v1602_v11 }
 0x31f   : > { %v812_v58 = vmul.f32 %v1234_v56, %v1604_v12  ;;  %839 = sbr.rel (!%p1374_p5) target bundleno = 834 (0x342), region = 44 }
 0x320   : > { %829 = vst [vmem:[%s1617_s8 + $0x68] sm:$0xff] %v813_v57 }
 0x321   : > { %v1236_v59 = vpop.eup %1235  ;;  %828 = vst [vmem:[%s1617_s8 + $0x60] sm:$0xff] %v812_v58 }
 0x322   : > { %v1238_v60 = vpop.eup %1237  ;;  %v815_v61 = vmul.f32 %v1236_v59, %v1608_v13 }
 0x323   : > { %v814_v62 = vmul.f32 %v1238_v60, %v1610_v14 }
 0x324   : > { %831 = vst [vmem:[%s1617_s8 + $0x78] sm:$0xff] %v815_v61 }
 0x325   : > { %830 = vst [vmem:[%s1617_s8 + $0x70] sm:$0xff] %v814_v62 }
 0x326   : > { %s1726_s11 = smov (!%p842_p11, %s841_s11), 16 }
 0x327   : > { %s1657_s12 = sshll.u32 %s1726_s11, 7 }
 0x328   : > { %s846_s13 = ssub.s32 2048, %s1657_s12 }
 0x329   : > { %847 = vsyncadd %s1652_s10, %s846_s13  ;;  %p942_p12 = scmp.ne.s32.totalorder %s1657_s12, 0  ;;  %s948_s14 = sshll.u32 %s1357_s22, 11 }
 0x32a   : > { %s1666_s16 = scalar_lea.hbm %s1718_s5, %s948_s14  ;;  %s852_s9 = sshll.u32 %s1617_s8, 4  ;;  %s1669_s9 = int_to_ptr.vmem [resolvable:$true] %s852_s9 }
 0x32b   : > { %s1239_s17 = scalar_lea.vmem %s1669_s9, %s1657_s12  ;;  %s1303_s23 = smov [#allocation2]  }
 0x32c   : > { %p1240_p13 = scmp.ne.s32.totalorder %s1669_s9, %s1239_s17  ;;  %s1243_s25 = sshll.u32 %s1303_s23, 4  ;;  %s1244_s25 = int_to_ptr.vmem [resolvable:$false] %s1243_s25 }
 0x32d   : > { %s1245_s22 = scalar_lea.vmem %s1244_s25, 4096  ;;  %p1246_p2 = scmp.lt.s32.totalorder %s1669_s9, %s1244_s25 }
 0x32e   : > { %p1241_p0 = pnand %p1240_p13, %p942_p12  ;;  %p1247_p3 = scmp.lt.s32.totalorder %s1245_s22, %s1239_s17 }
 0x330   : > { %p1242_p1 = pneg %p1241_p0  ;;  %p1248_p4 = por %p1247_p3, %p1246_p2 }
 0x332   : > { %p1249_p5 = pnand %p1248_p4, %p1242_p1 }
 0x334   : > { %1252 = shalt.err (!%p1249_p5)
}
 0x335   : > { %s1253_s6 = scalar_lea.hbm %s1666_s16, %s1657_s12  ;;  %s1257_s7 = scalar_lea.hbm %s1718_s5, 4864 }
 0x336   : > { %p1254_p7 = scmp.ne.s32.totalorder %s1666_s16, %s1253_s6  ;;  %p1258_p10 = scmp.lt.u32.totalorder %s1666_s16, %s1718_s5 }
 0x337   : > { %p1259_p11 = scmp.lt.u32.totalorder %s1257_s7, %s1253_s6  ;;  %p1261_p0 = scmp.lt.u32.totalorder %s1253_s6, %s1666_s16 }
 0x338   : > { %p1255_p8 = pnand %p1254_p7, %p942_p12 }
 0x339   : > { %p1260_p13 = por %p1259_p11, %p1258_p10 }
 0x33a   : > { %p1256_p9 = pneg %p1255_p8 }
 0x33b   : > { %p1262_p1 = por %p1261_p0, %p1260_p13 }
 0x33d   : > { %p1263_p2 = pnand %p1262_p1, %p1256_p9 }
 0x33f   : > { %1266 = shalt.err (!%p1263_p2)
}
 0x340   : > { %s1304_s13 = smov 128   ;;  %s1305_s14 = smov 8  }
 0x341   : > { %858 = dma.vmem_to_hbm [thread:$0]  (%p942_p12), %s1669_s9, %s1657_s12, %s1666_s16, %s1652_s10, %s1304_s13, %s1304_s13, %s1305_s14  }
 0x342 PF: > { %p1140_p3 = scmp.ge.s32.totalorder %s1301_s21, 2  ;;  %s867_s15 = sand.u32 1, %s1289_s18  }
 0x343   : > { %s868_s28 = scalar_lea.sflag [#allocation3], %s867_s15 }
 0x344   : > { %p1137_p4 = pnand %p1140_p3, %p1378_p6 }
 0x346   : > { %1284 = dma.done.wait (!%p1137_p4), %s868_s28, 2048  }
 0x347   : > { %1286 = vsyncadd (!%p1137_p4), %s868_s28, 4294965248  ;;  %p15_p5 = scmp.ge.s32.totalorder %s1361_s24, 5   ;;  %s1721_s18 = smov %s1293_s19 }
 0x348   : > { %s1722_s19 = smov %s1297_s20  ;;  %s1723_s20 = smov %s1372_s27 }
 0x349   : > { %s1724_s21 = smov %s1361_s24  ;;  %17 = sbr.rel (!%p15_p5) target bundleno = 3 (0x3), region = 75 }
 0x350   :  { %873 = vsyncpa [#allocation3], 1 }
 0x351   :  { %875 = vsyncpa [#allocation3 + $0x1], 1 }

</bundles_post_ra>
